<compile_context>
chip_gen: v6e
topology: v6e:2x2x1
jax: 0.10.0
libtpu: 0.0.40
codegen_flags: <defaults>
</compile_context>

<pallas_src>
import jax
import jax.numpy as jnp
import numpy as np
from jax.experimental import pallas as pl
from jax.experimental.pallas import tpu as pltpu


def _round_up(n, m):
    return ((n + m - 1) // m) * m


def _pad2d(a, rows, cols):
    r, c = a.shape
    if r == rows and c == cols:
        return a
    return jnp.pad(a, ((0, rows - r), (0, cols - c)))


def _policy_kernel(x_ref, w1_ref, b1_ref, w2_ref, b2_ref, w3_ref, b3_ref, o_ref):
    # One batch block per grid step. All three matmuls hit the MXU with f32
    # accumulation; tanh/sigmoid run on the VPU/EUP in f32. Biases are f32.
    wdt = w1_ref.dtype

    x = x_ref[...].astype(wdt)
    h1 = jnp.dot(x, w1_ref[...], preferred_element_type=jnp.float32)
    h1 = jnp.tanh(h1 + b1_ref[...])

    h2 = jnp.dot(h1.astype(wdt), w2_ref[...], preferred_element_type=jnp.float32)
    h2 = jnp.tanh(h2 + b2_ref[...])

    h3 = jnp.dot(h2.astype(wdt), w3_ref[...], preferred_element_type=jnp.float32)
    o_ref[...] = jax.nn.sigmoid(h3 + b3_ref[...])


def policy_forward(x, params, *, batch_block=2048, lane=128):
    """x: [B, dim_in] float32. params: w1,b1,w2,b2,w3,b3 ([in,out] / [1,out])."""
    w1, b1 = params["w1"], params["b1"]
    w2, b2 = params["w2"], params["b2"]
    w3, b3 = params["w3"], params["b3"]

    B, dim_in = x.shape
    hidden = w1.shape[1]
    dim_out = w3.shape[1]

    # Hidden dims padded to full 128-lane width (zero pad is inert for real
    # columns); output dim stays unpadded so HBM writeback is only dim_out wide.
    h_p = _round_up(hidden, lane)
    w1p, b1p = _pad2d(w1, dim_in, h_p), _pad2d(b1, 1, h_p)
    w2p, b2p = _pad2d(w2, h_p, h_p), _pad2d(b2, 1, h_p)
    w3p, b3p = _pad2d(w3, h_p, dim_out), b3

    # Batch tile: multiple of 8, capped at batch_block, and sized so the grid
    # has >= 2 blocks — the "parallel" axis is how v7x's 2 TCs split the work.
    bb = min(batch_block, max(8, _round_up(pl.cdiv(B, 2), 8)))
    B_p = _round_up(B, 8)
    x_p = jnp.pad(x, ((0, B_p - B), (0, 0))) if B_p != B else x
    grid = (pl.cdiv(B_p, bb),)  # ragged last block handled by Pallas

    def resident(arr):
        # Same block index every grid step -> DMA'd once, stays in VMEM.
        nd = arr.ndim
        return pl.BlockSpec(arr.shape, lambda i: (0,) * nd)

    out = pl.pallas_call(
        _policy_kernel,
        out_shape=jax.ShapeDtypeStruct((B_p, dim_out), jnp.float32),
        grid=grid,
        in_specs=[
            pl.BlockSpec((bb, dim_in), lambda i: (i, 0)),
            resident(w1p), resident(b1p),
            resident(w2p), resident(b2p),
            resident(w3p), resident(b3p),
        ],
        out_specs=pl.BlockSpec((bb, dim_out), lambda i: (i, 0)),
        compiler_params=pltpu.CompilerParams(
            dimension_semantics=("parallel",),
            vmem_limit_bytes=32 * 1024 * 1024,  # lifts v5e's 16 MiB scoped cap
        ),
    )(x_p, w1p, b1p, w2p, b2p, w3p, b3p)

    return out[:B] if B_p != B else out


def init_policy_params(key, dim_in, dim_out, hidden, weights_dtype=jnp.float32):
    """Deterministic init mimicking nn.Linear default (uniform +/- 1/sqrt(fan_in)).

    Weights may be bf16 (v6e/v7x); biases always stay f32.
    """
    ks = jax.random.split(key, 6)

    def linear(kw, kb, fan_in, fan_out):
        bound = 1.0 / np.sqrt(fan_in)
        w = jax.random.uniform(kw, (fan_in, fan_out), jnp.float32, -bound, bound)
        b = jax.random.uniform(kb, (1, fan_out), jnp.float32, -bound, bound)
        return w.astype(weights_dtype), b  # bias kept f32

    w1, b1 = linear(ks[0], ks[1], dim_in, hidden)
    w2, b2 = linear(ks[2], ks[3], hidden, hidden)
    w3, b3 = linear(ks[4], ks[5], hidden, dim_out)
    return {"w1": w1, "b1": b1, "w2": w2, "b2": b2, "w3": w3, "b3": b3}


def _reference_forward(x, p):
    f32 = lambda a: a.astype(jnp.float32)
    h1 = jnp.tanh(x @ f32(p["w1"]) + p["b1"])
    h2 = jnp.tanh(h1 @ f32(p["w2"]) + p["b2"])
    return jax.nn.sigmoid(h2 @ f32(p["w3"]) + p["b3"])


if __name__ == "__main__":
    # CartPole-style sizes: obs dim 4, action dim 2, hidden 32.
    B, dim_in, dim_out, hidden = 8, 4, 2, 32

    key = jax.random.PRNGKey(0)
    k_params, k_x, k_pop = jax.random.split(key, 3)
    params = init_policy_params(k_params, dim_in, dim_out, hidden)

    # Small batch (matches the original module's usage).
    x = jax.random.normal(k_x, (B, dim_in), jnp.float32)
    out = jax.block_until_ready(policy_forward(x, params))
    ref = _reference_forward(x, params)
    np.testing.assert_allclose(np.asarray(out), np.asarray(ref), rtol=1e-5, atol=1e-5)

    # ES-population-style batch: 2 parallel blocks of 256 rows (grid kept >= 2
    # blocks for v7x's two TensorCores), weights VMEM-resident, narrow f32
    # output writeback.
    xb = jax.random.normal(k_pop, (512, dim_in), jnp.float32)
    outb = jax.block_until_ready(policy_forward(xb, params))
    refb = _reference_forward(xb, params)
    np.testing.assert_allclose(np.asarray(outb), np.asarray(refb), rtol=1e-5, atol=1e-5)

    # Ragged-population case: batch not a multiple of the tile (exercises
    # cdiv-based grid with a clipped last block instead of full-block padding).
    xr = jax.random.normal(k_pop, (300, dim_in), jnp.float32)
    outr = jax.block_until_ready(policy_forward(xr, params, batch_block=128))
    refr = _reference_forward(xr, params)
    np.testing.assert_allclose(np.asarray(outr), np.asarray(refr), rtol=1e-5, atol=1e-5)

    print("KERNEL_OK")
</pallas_src>

<mosaic_0001>
module attributes {stable_mosaic.version = 11 : i64} {
  func.func @_policy_kernel(%arg0: i32, %arg1: memref<8x4xf32, #tpu.memory_space<vmem>>, %arg2: memref<4x128xf32, #tpu.memory_space<vmem>>, %arg3: memref<1x128xf32, #tpu.memory_space<vmem>>, %arg4: memref<128x128xf32, #tpu.memory_space<vmem>>, %arg5: memref<1x128xf32, #tpu.memory_space<vmem>>, %arg6: memref<128x2xf32, #tpu.memory_space<vmem>>, %arg7: memref<1x2xf32, #tpu.memory_space<vmem>>, %arg8: memref<8x2xf32, #tpu.memory_space<vmem>>) attributes {dimension_semantics = [#tpu.dimension_semantics<parallel>], iteration_bounds = array<i64: 1>, scalar_prefetch = 0 : i64, scratch_operands = 0 : i64, tpu.core_type = #tpu.core_type<tc>, window_params = [{transform_indices = @transform_0, window_bounds = array<i64: 8, 4>}, {pipeline_mode = #tpu.pipeline_mode<synchronous>, transform_indices = @transform_1, window_bounds = array<i64: 4, 128>}, {pipeline_mode = #tpu.pipeline_mode<synchronous>, transform_indices = @transform_2, window_bounds = array<i64: 1, 128>}, {pipeline_mode = #tpu.pipeline_mode<synchronous>, transform_indices = @transform_3, window_bounds = array<i64: 128, 128>}, {pipeline_mode = #tpu.pipeline_mode<synchronous>, transform_indices = @transform_4, window_bounds = array<i64: 1, 128>}, {pipeline_mode = #tpu.pipeline_mode<synchronous>, transform_indices = @transform_5, window_bounds = array<i64: 128, 2>}, {pipeline_mode = #tpu.pipeline_mode<synchronous>, transform_indices = @transform_6, window_bounds = array<i64: 1, 2>}, {transform_indices = @transform_7, window_bounds = array<i64: 8, 2>}]} {
    %c0 = arith.constant 0 : index
    %c0_0 = arith.constant 0 : index
    %0 = vector.load %arg1[%c0, %c0_0] : memref<8x4xf32, #tpu.memory_space<vmem>>, vector<8x4xf32>
    %c0_1 = arith.constant 0 : index
    %c0_2 = arith.constant 0 : index
    %1 = vector.load %arg2[%c0_1, %c0_2] : memref<4x128xf32, #tpu.memory_space<vmem>>, vector<4x128xf32>
    %cst = arith.constant dense<0.000000e+00> : vector<8x128xf32>
    %2 = tpu.matmul %0, %1, %cst {dimension_numbers = #tpu.dot_dimension_numbers<[1], [0], [0], [1], [0, 0, 1, 1], [], []>} : vector<8x4xf32>, vector<4x128xf32>, vector<8x128xf32> -> vector<8x128xf32>
    %c0_3 = arith.constant 0 : index
    %c0_4 = arith.constant 0 : index
    %3 = vector.load %arg3[%c0_3, %c0_4] : memref<1x128xf32, #tpu.memory_space<vmem>>, vector<1x128xf32>
    %4 = vector.broadcast %3 : vector<1x128xf32> to vector<8x128xf32>
    %5 = arith.addf %2, %4 : vector<8x128xf32>
    %6 = math.tanh %5 : vector<8x128xf32>
    %c0_5 = arith.constant 0 : index
    %c0_6 = arith.constant 0 : index
    %7 = vector.load %arg4[%c0_5, %c0_6] : memref<128x128xf32, #tpu.memory_space<vmem>>, vector<128x128xf32>
    %cst_7 = arith.constant dense<0.000000e+00> : vector<8x128xf32>
    %8 = tpu.matmul %6, %7, %cst_7 {dimension_numbers = #tpu.dot_dimension_numbers<[1], [0], [0], [1], [0, 0, 1, 1], [], []>} : vector<8x128xf32>, vector<128x128xf32>, vector<8x128xf32> -> vector<8x128xf32>
    %c0_8 = arith.constant 0 : index
    %c0_9 = arith.constant 0 : index
    %9 = vector.load %arg5[%c0_8, %c0_9] : memref<1x128xf32, #tpu.memory_space<vmem>>, vector<1x128xf32>
    %10 = vector.broadcast %9 : vector<1x128xf32> to vector<8x128xf32>
    %11 = arith.addf %8, %10 : vector<8x128xf32>
    %12 = math.tanh %11 : vector<8x128xf32>
    %c0_10 = arith.constant 0 : index
    %c0_11 = arith.constant 0 : index
    %13 = vector.load %arg6[%c0_10, %c0_11] : memref<128x2xf32, #tpu.memory_space<vmem>>, vector<128x2xf32>
    %cst_12 = arith.constant dense<0.000000e+00> : vector<8x2xf32>
    %14 = tpu.matmul %12, %13, %cst_12 {dimension_numbers = #tpu.dot_dimension_numbers<[1], [0], [0], [1], [0, 0, 1, 1], [], []>} : vector<8x128xf32>, vector<128x2xf32>, vector<8x2xf32> -> vector<8x2xf32>
    %c0_13 = arith.constant 0 : index
    %c0_14 = arith.constant 0 : index
    %15 = vector.load %arg7[%c0_13, %c0_14] : memref<1x2xf32, #tpu.memory_space<vmem>>, vector<1x2xf32>
    %16 = vector.broadcast %15 : vector<1x2xf32> to vector<8x2xf32>
    %17 = arith.addf %14, %16 : vector<8x2xf32>
    %18 = arith.negf %17 : vector<8x2xf32>
    %19 = math.exp %18 : vector<8x2xf32>
    %cst_15 = arith.constant 1.000000e+00 : f32
    %20 = vector.broadcast %cst_15 : f32 to vector<8x2xf32>
    %21 = arith.addf %20, %19 : vector<8x2xf32>
    %22 = arith.divf %20, %21 : vector<8x2xf32>
    %c0_16 = arith.constant 0 : index
    %c0_17 = arith.constant 0 : index
    %23 = vector.load %arg8[%c0_16, %c0_17] : memref<8x2xf32, #tpu.memory_space<vmem>>, vector<8x2xf32>
    tpu.vector_store %arg8[%c0_16, %c0_17], %22 {strides = array<i32>} : memref<8x2xf32, #tpu.memory_space<vmem>>, vector<8x2xf32>,
    return
  }
  func.func @transform_0(%arg0: i32) -> (i32, i32) {
    %c0_i32 = arith.constant 0 : i32
    %c0_i32_0 = arith.constant 0 : i32
    return %arg0, %c0_i32 : i32, i32
  }
  func.func @transform_1(%arg0: i32) -> (i32, i32) {
    %c0_i32 = arith.constant 0 : i32
    %c0_i32_0 = arith.constant 0 : i32
    %c0_i32_1 = arith.constant 0 : i32
    return %c0_i32, %c0_i32_0 : i32, i32
  }
  func.func @transform_2(%arg0: i32) -> (i32, i32) {
    %c0_i32 = arith.constant 0 : i32
    %c0_i32_0 = arith.constant 0 : i32
    %c0_i32_1 = arith.constant 0 : i32
    return %c0_i32, %c0_i32_0 : i32, i32
  }
  func.func @transform_3(%arg0: i32) -> (i32, i32) {
    %c0_i32 = arith.constant 0 : i32
    %c0_i32_0 = arith.constant 0 : i32
    %c0_i32_1 = arith.constant 0 : i32
    return %c0_i32, %c0_i32_0 : i32, i32
  }
  func.func @transform_4(%arg0: i32) -> (i32, i32) {
    %c0_i32 = arith.constant 0 : i32
    %c0_i32_0 = arith.constant 0 : i32
    %c0_i32_1 = arith.constant 0 : i32
    return %c0_i32, %c0_i32_0 : i32, i32
  }
  func.func @transform_5(%arg0: i32) -> (i32, i32) {
    %c0_i32 = arith.constant 0 : i32
    %c0_i32_0 = arith.constant 0 : i32
    %c0_i32_1 = arith.constant 0 : i32
    return %c0_i32, %c0_i32_0 : i32, i32
  }
  func.func @transform_6(%arg0: i32) -> (i32, i32) {
    %c0_i32 = arith.constant 0 : i32
    %c0_i32_0 = arith.constant 0 : i32
    %c0_i32_1 = arith.constant 0 : i32
    return %c0_i32, %c0_i32_0 : i32, i32
  }
  func.func @transform_7(%arg0: i32) -> (i32, i32) {
    %c0_i32 = arith.constant 0 : i32
    %c0_i32_0 = arith.constant 0 : i32
    return %arg0, %c0_i32 : i32, i32
  }
}

</mosaic_0001>

<bundles_post_ra>
// kernel: tpu_custom_call.1
= control target key start
LH: loop header
LB: loop body
LE: loop exit
PB: predicated region body
PF: predicated region fallthrough
CT: control target
= control target key end

     0   :  { %vm39_vm0 = vcmask 1043456   ;;  %vm35_vm1 = vcmask 31744   ;;  %v440_v0 = vmov 0.0   ;;  %vm441_vm2 = vmmov 0   ;;  %s635_s1 = inlined_call_operand.vmem [shape: f32[4,128], index: 1, kind: input, shape index: {}]   ;;  %s636_s0 = inlined_call_operand.vmem [shape: f32[8,4], index: 0, kind: input, shape index: {}]   ;;  %s637_s3 = inlined_call_operand.vmem [shape: f32[128,128], index: 3, kind: input, shape index: {}]   ;;  %s638_s5 = inlined_call_operand.vmem [shape: f32[128,2], index: 5, kind: input, shape index: {}]   ;;  %s639_s2 = inlined_call_operand.vmem [shape: f32[1,128], index: 2, kind: input, shape index: {}]   ;;  %s640_s4 = inlined_call_operand.vmem [shape: f32[1,128], index: 4, kind: input, shape index: {}]   ;;  %s641_s6 = inlined_call_operand.vmem [shape: f32[1,2], index: 6, kind: input, shape index: {}]   ;;  %s642_s7 = inlined_call_operand.vmem [shape: f32[8,2], index: 7, kind: output, shape index: {}]  }
   0x1   :  { %355 = vmatprep.subr.mxu0 %v440_v0  ;;  %v27_v1 = vld [vmem:[%s635_s1] sm:$0xf]  ;;  %357 = vmatprep.mubr.msk.f32.mxu0 %vm441_vm2, %v440_v0  ;;  %v129_v3 = vld [vmem:[%s637_s3 + $0x78] sm:$0xff]  ;;  %v128_v4 = vld [vmem:[%s637_s3 + $0x70] sm:$0xff]  ;;  %vm307_vm3 = vcmask 15360  }
   0x2   :  { %v26_v2 = vld [vmem:[%s636_s0] sm:$0xff]  ;;  %356 = vmatpush3.msk.msra.mxu0 %vm39_vm0, %v27_v1  ;;  %360 = vmatprep.subr.mxu1 %v440_v0  ;;  %v127_v5 = vld [vmem:[%s637_s3 + $0x68] sm:$0xff]  ;;  %v125_v7 = vld [vmem:[%s637_s3 + $0x58] sm:$0xff] }
   0x3   :  { %358 = vmatmul.mubr.msk.f32.vlgmr.msra.gmra.mxu0 %vm35_vm1, %v26_v2  ;;  %361 = vmatpush3.msra.mxu1 %v129_v3  ;;  %v126_v6 = vld [vmem:[%s637_s3 + $0x60] sm:$0xff]  ;;  %v124_v8 = vld [vmem:[%s637_s3 + $0x50] sm:$0xff]  ;;  %v123_v9 = vld [vmem:[%s637_s3 + $0x48] sm:$0xff] }
   0x4   :  { %362 = vmatprep.subr.mxu1 %v440_v0  ;;  %392 = vmatprep.mubr.msk.f32.mxu1 %vm441_vm2, %v440_v0  ;;  %v122_v10 = vld [vmem:[%s637_s3 + $0x40] sm:$0xff]  ;;  %v121_v11 = vld [vmem:[%s637_s3 + $0x38] sm:$0xff]  ;;  %v120_v12 = vld [vmem:[%s637_s3 + $0x30] sm:$0xff] }
   0x5   :  { %363 = vmatpush3.msra.mxu1 %v128_v4  ;;  %395 = vmatprep.subr.mxu0 %v440_v0  ;;  %v119_v13 = vld [vmem:[%s637_s3 + $0x28] sm:$0xff]  ;;  %v118_v14 = vld [vmem:[%s637_s3 + $0x20] sm:$0xff]  ;;  %v117_v15 = vld [vmem:[%s637_s3 + $0x18] sm:$0xff] }
   0x6   :  { %364 = vmatprep.subr.mxu1 %v440_v0  ;;  %427 = vmatprep.mubr.msk.f32.mxu0 %vm441_vm2, %v440_v0  ;;  %v116_v16 = vld [vmem:[%s637_s3 + $0x10] sm:$0xff]  ;;  %v115_v17 = vld [vmem:[%s637_s3 + $0x8] sm:$0xff]  ;;  %v114_v18 = vld [vmem:[%s637_s3] sm:$0xff] }
   0x7   :  { %365 = vmatpush3.msra.mxu1 %v127_v5  ;;  %v223_v19 = vld [vmem:[%s638_s5 + $0x78] sm:$0xff]  ;;  %v222_v20 = vld [vmem:[%s638_s5 + $0x70] sm:$0xff]  ;;  %v221_v21 = vld [vmem:[%s638_s5 + $0x68] sm:$0xff] }
   0x8   :  { %366 = vmatprep.subr.mxu1 %v440_v0  ;;  %396 = vmatpush3.msra.mxu0 %v223_v19  ;;  %v220_v22 = vld [vmem:[%s638_s5 + $0x60] sm:$0xff]  ;;  %v219_v23 = vld [vmem:[%s638_s5 + $0x58] sm:$0xff]  ;;  %v218_v24 = vld [vmem:[%s638_s5 + $0x50] sm:$0xff] }
   0x9   :  { %367 = vmatpush3.msra.mxu1 %v126_v6  ;;  %397 = vmatprep.subr.mxu0 %v440_v0  ;;  %v217_v25 = vld [vmem:[%s638_s5 + $0x48] sm:$0xff]  ;;  %v313_v26 = vld [vmem:[%s639_s2] ss:$0 sm:$0xff]  ;;  %v215_v32 = vld [vmem:[%s638_s5 + $0x38] sm:$0xff] }
   0xa   :  { %368 = vmatprep.subr.mxu1 %v440_v0  ;;  %398 = vmatpush3.msra.mxu0 %v222_v20  ;;  %v216_v31 = vld [vmem:[%s638_s5 + $0x40] sm:$0xff]  ;;  %v214_v33 = vld [vmem:[%s638_s5 + $0x30] sm:$0xff]  ;;  %v213_v34 = vld [vmem:[%s638_s5 + $0x28] sm:$0xff] }
   0xb   :  { %369 = vmatpush3.msra.mxu1 %v125_v7  ;;  %399 = vmatprep.subr.mxu0 %v440_v0  ;;  %v212_v35 = vld [vmem:[%s638_s5 + $0x20] sm:$0xff]  ;;  %v211_v36 = vld [vmem:[%s638_s5 + $0x18] sm:$0xff]  ;;  %v210_v37 = vld [vmem:[%s638_s5 + $0x10] sm:$0xff] }
   0xc   :  { %370 = vmatprep.subr.mxu1 %v440_v0  ;;  %400 = vmatpush3.msra.mxu0 %v221_v21  ;;  %v209_v38 = vld [vmem:[%s638_s5 + $0x8] sm:$0xff]  ;;  %v208_v39 = vld [vmem:[%s638_s5] sm:$0xff] }
   0xd   :  { %371 = vmatpush3.msra.mxu1 %v124_v8  ;;  %401 = vmatprep.subr.mxu0 %v440_v0  ;;  %v316_v40 = vld [vmem:[%s640_s4] ss:$0 sm:$0xff] }
   0xe   :  { %372 = vmatprep.subr.mxu1 %v440_v0  ;;  %402 = vmatpush3.msra.mxu0 %v220_v22  ;;  %v317_v45 = vld [vmem:[%s641_s6] ss:$0 sm:$0xff] }
   0xf   :  { %373 = vmatpush3.msra.mxu1 %v123_v9  ;;  %403 = vmatprep.subr.mxu0 %v440_v0 }
  0x10   :  { %374 = vmatprep.subr.mxu1 %v440_v0  ;;  %404 = vmatpush3.msra.mxu0 %v219_v23 }
  0x11   :  { %375 = vmatpush3.msra.mxu1 %v122_v10  ;;  %405 = vmatprep.subr.mxu0 %v440_v0 }
  0x12   :  { %376 = vmatprep.subr.mxu1 %v440_v0  ;;  %406 = vmatpush3.msra.mxu0 %v218_v24 }
  0x13   :  { %377 = vmatpush3.msra.mxu1 %v121_v11  ;;  %407 = vmatprep.subr.mxu0 %v440_v0 }
  0x14   :  { %378 = vmatprep.subr.mxu1 %v440_v0  ;;  %408 = vmatpush3.msra.mxu0 %v217_v25 }
  0x15   :  { %379 = vmatpush3.msra.mxu1 %v120_v12  ;;  %409 = vmatprep.subr.mxu0 %v440_v0 }
  0x16   :  { %380 = vmatprep.subr.mxu1 %v440_v0  ;;  %410 = vmatpush3.msra.mxu0 %v216_v31 }
  0x17   :  { %381 = vmatpush3.msra.mxu1 %v119_v13  ;;  %411 = vmatprep.subr.mxu0 %v440_v0 }
  0x18   :  { %382 = vmatprep.subr.mxu1 %v440_v0  ;;  %412 = vmatpush3.msra.mxu0 %v215_v32 }
  0x19   :  { %383 = vmatpush3.msra.mxu1 %v118_v14  ;;  %413 = vmatprep.subr.mxu0 %v440_v0 }
  0x1a   :  { %384 = vmatprep.subr.mxu1 %v440_v0  ;;  %414 = vmatpush3.msra.mxu0 %v214_v33 }
  0x1b   :  { %385 = vmatpush3.msra.mxu1 %v117_v15  ;;  %415 = vmatprep.subr.mxu0 %v440_v0 }
  0x1c   :  { %386 = vmatprep.subr.mxu1 %v440_v0  ;;  %416 = vmatpush3.msra.mxu0 %v213_v34 }
  0x1d   :  { %387 = vmatpush3.msra.mxu1 %v116_v16  ;;  %417 = vmatprep.subr.mxu0 %v440_v0 }
  0x1e   :  { %388 = vmatprep.subr.mxu1 %v440_v0  ;;  %418 = vmatpush3.msra.mxu0 %v212_v35 }
  0x1f   :  { %389 = vmatpush3.msra.mxu1 %v115_v17  ;;  %419 = vmatprep.subr.mxu0 %v440_v0 }
  0x20   :  { %390 = vmatprep.subr.mxu1 %v440_v0  ;;  %420 = vmatpush3.msra.mxu0 %v211_v36 }
  0x21   :  { %391 = vmatpush3.msra.mxu1 %v114_v18  ;;  %421 = vmatprep.subr.mxu0 %v440_v0 }
  0x22   :  { %422 = vmatpush3.msra.mxu0 %v210_v37 }
  0x23   :  { %423 = vmatprep.subr.mxu0 %v440_v0 }
  0x24   :  { %424 = vmatpush3.msra.mxu0 %v209_v38 }
  0x25   :  { %425 = vmatprep.subr.mxu0 %v440_v0 }
  0x26   :  { %426 = vmatpush3.msra.mxu0 %v208_v39 }
  0xc3   :  { %v109_v27 = vpop.f32.mrf.mxu0 }
  0xc4   :  { %v110_v28 = vadd.f32 %v313_v26, %v109_v27 }
  0xc5   :  { %v359_v29 = vpop.f32.mrf.mxu0 }
  0xc6   :  { %432 = vtanh.f32 %v110_v28 }
  0xd3   :  { %v433_v30 = vpop.eup %432 }
  0xd4   :  { %393 = vmatmul.mubr.f32.vlgmr.msra.gmra.mxu1 %v433_v30 }
 0x194   :  { %v203_v41 = vpop.f32.mrf.mxu1 }
 0x195   :  { %v204_v42 = vadd.f32 %v316_v40, %v203_v41 }
 0x196   :  { %v394_v43 = vpop.f32.mrf.mxu1 }
 0x197   :  { %434 = vtanh.f32 %v204_v42 }
 0x1a4   :  { %v435_v44 = vpop.eup %434 }
 0x1a5   :  { %428 = vmatmul.mubr.f32.vlgmr.msra.gmra.mxu0 %v435_v44 }
 0x265   :  { %v297_v46 = vpop.f32.mrf.mxu0 }
 0x266   :  { %v298_v47 = vadd.f32 %v317_v45, %v297_v46 }
 0x267   :  { %v429_v48 = vpop.f32.mrf.mxu0 }
 0x268   :  { %v318_v49 = vmul.f32 -1.442695, %v298_v47 }
 0x26a   :  { %436 = vpow2.f32 %v318_v49 }
 0x277   :  { %v437_v50 = vpop.eup %436 }
 0x278   :  { %v304_v51 = vadd.f32 1.0, %v437_v50 }
 0x27a   :  { %438 = vrcp.f32 %v304_v51 }
 0x287   :  { %v439_v52 = vpop.eup %438 }
 0x288   :  { %308 = vst.msk [vmem:[%s642_s7] sm:$0xff] %vm307_vm3, %v439_v52 }

</bundles_post_ra>
